<compile_context>
chip_gen: v7x
topology: tpu7x:2x2x1
jax: 0.10.0
libtpu: 0.0.40
codegen_flags: <defaults>
</compile_context>

<pallas_src>
import functools
import math

import jax
import jax.numpy as jnp
from jax import lax
from jax.experimental import pallas as pl
from jax.experimental.pallas import tpu as pltpu


# ----------------------------------------------------------------------------
# Kernel
# ----------------------------------------------------------------------------
def _seqconv_rep_kernel(xa_ref, xb_ref, w_ref, b_ref, o_ref, *, width):
    """One row-tile of the re-parameterized 3x3 conv.

    xa_ref: (1, Cin, TH*W)    H-padded input rows [t*TH, t*TH+TH), W-major flat
    xb_ref: (1, Cin, HALO*W)  H-padded input rows [t*TH+TH, ...) (bottom halo)
    w_ref : (3, Cout, 3*Cin)  effective weight; w_ref[di][o, dj*Cin + c]
    b_ref : (Cout, 1)         effective bias
    o_ref : (1, Cout, TH*W)   output tile (last dim is a multiple of 128)
    """
    _, cin, m = xa_ref.shape
    halo_m = xb_ref.shape[2]
    total = m + halo_m

    xa = xa_ref[0]                                               # (Cin, m)
    # Lane-aligned concat (both pieces are multiples of 128 lanes): one
    # contiguous working buffer covering every row this tile touches.
    xwide = jnp.concatenate([xa, xb_ref[0]], axis=1)             # (Cin, total)

    # Horizontal border masks, built once at (Cin, m) and reused for all taps
    # (the W border of the zero pad is never materialized, only masked).
    col = lax.broadcasted_iota(jnp.int32, (cin, m), 1) % width
    left_ok = col >= 1            # tap dj == 0 reads column w - 1
    right_ok = col <= width - 2   # tap dj == 2 reads column w + 1

    def row_group(base):
        # base[:, p] = padded input at the dj=1 tap of this kernel row.
        # Lane rotations go to the XLU; the wrapped lanes are exactly the
        # masked (image-border) positions, so wraparound is harmless.
        left = jnp.where(left_ok, pltpu.roll(base, shift=1, axis=1), 0.0)
        right = jnp.where(right_ok, pltpu.roll(base, shift=m - 1, axis=1), 0.0)
        return jnp.concatenate([left, base, right], axis=0)      # (3*Cin, m)

    acc = None
    for di in range(3):
        if di == 0:
            base = xa                                            # no shift needed
        else:
            # base[:, p] = xwide[:, p + di*W]; no wraparound reaches p < m.
            base = pltpu.roll(xwide, shift=total - di * width, axis=1)[:, :m]
        group = row_group(base).astype(w_ref.dtype)              # bf16 hook on v6e/v7x
        part = jnp.dot(w_ref[di], group, preferred_element_type=jnp.float32)
        acc = part if acc is None else acc + part

    o_ref[0] = (acc + b_ref[...]).astype(o_ref.dtype)


# ----------------------------------------------------------------------------
# Tile-size / VMEM heuristics
# ----------------------------------------------------------------------------
def _halo_rows(width):
    """Smallest row count >= 2 whose flattened lane extent is a multiple of 128."""
    h = 128 // math.gcd(width, 128)
    return h if h >= 2 else 2


def _tile_vmem_bytes(tile_h, width, cin_p, cout, halo):
    """Peak VMEM for one grid step: double-buffered BlockSpec buffers PLUS the
    in-kernel temporaries (xwide, masks, rolled taps / group concat, acc)."""
    m = tile_h * width
    halo_m = halo * width
    io = 2 * 4 * (cin_p * m + cin_p * halo_m + cout * m)          # pipelined blocks
    wgt = 2 * 4 * (3 * cout * 3 * cin_p + cout)
    tmp = 4 * (cin_p * (m + halo_m)        # xwide
               + 3 * cin_p * m             # col / masks
               + 6 * cin_p * m             # rolled taps + per-row group concat
               + 2 * cout * m)             # matmul partial + accumulator
    return io + wgt + tmp


def _pick_tile_h(batch, h, width, cin_p, cout, halo, budget):
    cands = sorted((th for th in range(halo, h + 1, halo) if h % th == 0),
                   reverse=True)
    if not cands:
        raise ValueError(
            f"H={h} must be a multiple of the halo row count {halo}; pad H first")
    tile_h = cands[-1]
    for th in cands:
        if _tile_vmem_bytes(th, width, cin_p, cout, halo) <= budget:
            tile_h = th
            break
    # Keep >= 2 grid steps so both TensorCores get work on dual-core chips (v7x).
    while batch * (h // tile_h) < 2 and tile_h > cands[-1]:
        tile_h = max(c for c in cands if c < tile_h)
    return tile_h


# ----------------------------------------------------------------------------
# Pallas wrapper (re-parameterized 3x3 conv, NCHW in / NCHW out)
# ----------------------------------------------------------------------------
def seqconv3x3_rep(x_nchw, w_oijc, b_eff, *, tile_h=None):
    """Re-parameterized SeqConv3x3 forward: ONE 3x3 conv over zero-padded x.

    x_nchw: (N, Cin, H, W) float32
    w_oijc: (Cout, 3, 3, Cin) effective 3x3 weight
    b_eff : (Cout,)           effective bias
    returns (N, Cout, H, W) float32
    """
    N, Cin, H, W = x_nchw.shape
    Cout = w_oijc.shape[0]
    halo = _halo_rows(W)

    # Pad Cin to a whole sublane tile so taps / concats are tile-aligned copies.
    cin_p = -(-Cin // 8) * 8
    if cin_p != Cin:
        x_nchw = jnp.pad(x_nchw, ((0, 0), (0, cin_p - Cin), (0, 0), (0, 0)))
        w_oijc = jnp.pad(w_oijc, ((0, 0), (0, 0), (0, 0), (0, cin_p - Cin)))

    # Generation-aware VMEM budget: v7x has 64 MiB physical per TC -> ~51 MiB
    # cap; v5e/v6e have 128 MiB -> ~102 MiB cap.  Leave headroom for compiler
    # scratch, and size the tile from the FULL footprint (incl. temporaries).
    try:
        phys_vmem = int(pltpu.get_tpu_info().vmem_capacity_bytes)
    except Exception:  # unknown chip: assume the smallest (v7x-like) VMEM
        phys_vmem = 64 * 2 ** 20
    vmem_limit = min(int(phys_vmem * 0.80), 110 * 2 ** 20)
    budget = int(vmem_limit * 0.75)

    if tile_h is None:
        tile_h = _pick_tile_h(N, H, W, cin_p, Cout, halo, budget)
    if H % tile_h or tile_h % halo:
        raise ValueError(
            f"tile_h={tile_h} must divide H={H} and be a multiple of {halo}")

    # Pad in H only: 1 zero row on top (the real top pad) + halo-1 rows at the
    # bottom (row H+1 is the real bottom pad; the rest only keep the halo block
    # in bounds).  The W border is handled by masks inside the kernel.
    x_hpad = jnp.pad(x_nchw, ((0, 0), (0, 0), (1, halo - 1), (0, 0)))
    x_flat = x_hpad.reshape(N, cin_p, (H + halo) * W)          # W-major flat

    # Weight layout (3, Cout, 3*Cin): per-kernel-row slab, indexed by a leading
    # axis inside the kernel (no lane slicing of the weight ref).
    w_rows = jnp.transpose(w_oijc, (1, 0, 2, 3)).reshape(3, Cout, 3 * cin_p)
    w_rows = w_rows.astype(jnp.float32)
    b_col = b_eff.reshape(Cout, 1).astype(jnp.float32)

    n_ht = H // tile_h
    m = tile_h * W
    halo_m = halo * W
    halo_stride = tile_h // halo

    out_flat = pl.pallas_call(
        functools.partial(_seqconv_rep_kernel, width=W),
        out_shape=jax.ShapeDtypeStruct((N, Cout, H * W), jnp.float32),
        grid_spec=pltpu.PrefetchScalarGridSpec(
            num_scalar_prefetch=0,
            grid=(N, n_ht),
            in_specs=[
                # rows [t*TH, t*TH+TH) of the H-padded input (flattened)
                pl.BlockSpec((1, cin_p, m), lambda n, t: (n, 0, t)),
                # bottom halo: rows [t*TH+TH, t*TH+TH+halo)
                pl.BlockSpec((1, cin_p, halo_m),
                             lambda n, t: (n, 0, (t + 1) * halo_stride)),
                # effective weight / bias: resident across the whole grid
                pl.BlockSpec((3, Cout, 3 * cin_p), lambda n, t: (0, 0, 0)),
                pl.BlockSpec((Cout, 1), lambda n, t: (0, 0)),
            ],
            out_specs=pl.BlockSpec((1, Cout, m), lambda n, t: (n, 0, t)),
        ),
        compiler_params=pltpu.CompilerParams(
            dimension_semantics=("parallel", "parallel"),
            vmem_limit_bytes=int(vmem_limit),
        ),
    )(x_flat, x_flat, w_rows, b_col)
    return out_flat.reshape(N, Cout, H, W)


# ----------------------------------------------------------------------------
# Exact re-parameterization (same algebra as SeqConv3x3.rep_params)
# ----------------------------------------------------------------------------
def rep_conv1x1_conv3x3(k0_oihw, b0, k1_oihw, b1):
    """Fold conv1x1(k0,b0) + b0 border pad + conv3x3(k1,b1) into one 3x3 conv.
    Exact for the forward pass.  Returns (Cout,3,3,Cin) weight and (Cout,) bias."""
    k0m = k0_oihw[:, :, 0, 0]                                  # (Cmid, Cin)
    w = jnp.einsum('omij,mc->oijc', k1_oihw, k0m)              # (Cout, 3, 3, Cin)
    b = b1 + jnp.einsum('omij,m->o', k1_oihw, b0)
    return w, b


def rep_conv1x1_depthwise3x3(k0_oihw, b0, scale, mask, bias):
    """Fold conv1x1(k0,b0) + b0 border pad + depthwise(scale*mask, bias) conv.
    Covers 'conv1x1-sobelx' / 'conv1x1-sobely' / 'conv1x1-laplacian'."""
    k0m = k0_oihw[:, :, 0, 0]                                  # (Cout, Cin)
    dw = (scale * mask)[:, 0]                                  # (Cout, 3, 3)
    w = jnp.einsum('oij,oc->oijc', dw, k0m)                    # (Cout, 3, 3, Cin)
    b = bias + b0 * jnp.sum(dw, axis=(1, 2))
    return w, b


# Per-branch entry points (module parity).  For best performance, fuse several
# branches by concatenating (w, b) along Cout and calling seqconv3x3_rep once.
def seqconv_conv1x1_conv3x3(x_nchw, k0, b0, k1, b1, *, tile_h=None):
    w, b = rep_conv1x1_conv3x3(k0, b0, k1, b1)
    return seqconv3x3_rep(x_nchw, w, b, tile_h=tile_h)


def seqconv_conv1x1_depthwise3x3(x_nchw, k0, b0, scale, mask, bias, *, tile_h=None):
    w, b = rep_conv1x1_depthwise3x3(k0, b0, scale, mask, bias)
    return seqconv3x3_rep(x_nchw, w, b, tile_h=tile_h)


# ----------------------------------------------------------------------------
# Pure-JAX two-stage NCHW reference (mirrors the PyTorch forward exactly)
# ----------------------------------------------------------------------------
def _ref_forward_nchw(x, k0_oihw, b0, k1_oihw, b1, groups=1):
    dn = ('NCHW', 'OIHW', 'NCHW')
    y0 = lax.conv_general_dilated(x, k0_oihw, (1, 1), 'VALID',
                                  dimension_numbers=dn) + b0.reshape(1, -1, 1, 1)
    y0p = jnp.pad(y0, ((0, 0), (0, 0), (1, 1), (1, 1)))
    bpad = b0.reshape(1, -1, 1, 1)
    y0p = y0p.at[:, :, 0:1, :].set(bpad)
    y0p = y0p.at[:, :, -1:, :].set(bpad)
    y0p = y0p.at[:, :, :, 0:1].set(bpad)
    y0p = y0p.at[:, :, :, -1:].set(bpad)
    y1 = lax.conv_general_dilated(y0p, k1_oihw, (1, 1), 'VALID',
                                  dimension_numbers=dn,
                                  feature_group_count=groups)
    return y1 + b1.reshape(1, -1, 1, 1)


# ----------------------------------------------------------------------------
# Main
# ----------------------------------------------------------------------------
if __name__ == "__main__":
    N, Cin, H, W = 2, 4, 16, 16
    Cout = 8
    depth_multiplier = 2
    Cmid = Cout * depth_multiplier

    key = jax.random.PRNGKey(0)
    ks = jax.random.split(key, 8)

    x_nchw = jax.random.normal(ks[0], (N, Cin, H, W), jnp.float32)

    # --- branch 1: 'conv1x1-conv3x3' ---
    k0_oihw = jax.random.normal(ks[1], (Cmid, Cin, 1, 1), jnp.float32) * 0.1
    b0 = jax.random.normal(ks[2], (Cmid,), jnp.float32) * 0.1
    k1_oihw = jax.random.normal(ks[3], (Cout, Cmid, 3, 3), jnp.float32) * 0.1
    b1 = jax.random.normal(ks[4], (Cout,), jnp.float32) * 0.1

    # --- branch 2: 'conv1x1-sobelx' (depthwise scale*mask) ---
    k0d_oihw = jax.random.normal(ks[5], (Cout, Cin, 1, 1), jnp.float32) * 0.1
    b0d = jax.random.normal(ks[6], (Cout,), jnp.float32) * 0.1
    scale = jax.random.normal(ks[7], (Cout, 1, 1, 1), jnp.float32) * 0.001
    dbias = jax.random.normal(jax.random.PRNGKey(1), (Cout,), jnp.float32) * 0.001
    sobelx = jnp.array([[1., 0., -1.], [2., 0., -2.], [1., 0., -1.]], jnp.float32)
    mask = jnp.broadcast_to(sobelx, (Cout, 1, 3, 3))

    # exact re-parameterization of both branches, fused into ONE kernel launch
    w_dense, b_dense = rep_conv1x1_conv3x3(k0_oihw, b0, k1_oihw, b1)
    w_dw, b_dw = rep_conv1x1_depthwise3x3(k0d_oihw, b0d, scale, mask, dbias)
    w_all = jnp.concatenate([w_dense, w_dw], axis=0)      # (2*Cout, 3, 3, Cin)
    b_all = jnp.concatenate([b_dense, b_dw], axis=0)      # (2*Cout,)

    y_all = seqconv3x3_rep(x_nchw, w_all, b_all)          # auto (VMEM-aware) tile_h
    y_all = jax.block_until_ready(y_all)
    y_dense, y_dw = y_all[:, :Cout], y_all[:, Cout:]

    # verify against the plain-JAX two-stage reference (torch forward semantics)
    ref_dense = _ref_forward_nchw(x_nchw, k0_oihw, b0, k1_oihw, b1, groups=1)
    ref_dw = _ref_forward_nchw(x_nchw, k0d_oihw, b0d, scale * mask, dbias,
                               groups=Cout)

    assert y_dense.shape == (N, Cout, H, W)
    assert y_dw.shape == (N, Cout, H, W)
    assert jnp.allclose(y_dense, ref_dense, atol=1e-4, rtol=1e-4)
    assert jnp.allclose(y_dw, ref_dw, atol=1e-4, rtol=1e-4)

    print("KERNEL_OK")
</pallas_src>

<mosaic_0001>
module attributes {stable_mosaic.version = 11 : i64} {
  func.func @_seqconv_rep_kernel(%arg0: i32, %arg1: i32, %arg2: memref<1x8x256xf32, #tpu.memory_space<vmem>>, %arg3: memref<1x8x128xf32, #tpu.memory_space<vmem>>, %arg4: memref<3x16x24xf32, #tpu.memory_space<vmem>>, %arg5: memref<16x1xf32, #tpu.memory_space<vmem>>, %arg6: memref<1x16x256xf32, #tpu.memory_space<vmem>>) attributes {dimension_semantics = [#tpu.dimension_semantics<parallel>, #tpu.dimension_semantics<parallel>], iteration_bounds = array<i64: 2, 1>, scalar_prefetch = 0 : i64, scratch_operands = 0 : i64, tpu.core_type = #tpu.core_type<tc>, window_params = [{transform_indices = @transform_0, window_bounds = array<i64: 1, 8, 256>}, {transform_indices = @transform_1, window_bounds = array<i64: 1, 8, 128>}, {pipeline_mode = #tpu.pipeline_mode<synchronous>, transform_indices = @transform_2, window_bounds = array<i64: 3, 16, 24>}, {pipeline_mode = #tpu.pipeline_mode<synchronous>, transform_indices = @transform_3, window_bounds = array<i64: 16, 1>}, {transform_indices = @transform_4, window_bounds = array<i64: 1, 16, 256>}]} {
    %c0 = arith.constant 0 : index
    %c0_0 = arith.constant 0 : index
    %c0_1 = arith.constant 0 : index
    %0 = vector.load %arg2[%c0, %c0_0, %c0_1] : memref<1x8x256xf32, #tpu.memory_space<vmem>>, vector<1x8x256xf32>
    %1 = vector.shape_cast %0 : vector<1x8x256xf32> to vector<8x256xf32>
    %c0_2 = arith.constant 0 : index
    %c0_3 = arith.constant 0 : index
    %c0_4 = arith.constant 0 : index
    %2 = vector.load %arg3[%c0_2, %c0_3, %c0_4] : memref<1x8x128xf32, #tpu.memory_space<vmem>>, vector<1x8x128xf32>
    %3 = vector.shape_cast %2 : vector<1x8x128xf32> to vector<8x128xf32>
    %4 = tpu.concatenate %1, %3 in 1 : vector<8x256xf32>, vector<8x128xf32> -> vector<8x384xf32>
    %5 = tpu.iota {dimensions = array<i32: 1>} : vector<8x256xi32>
    %c16_i32 = arith.constant 16 : i32
    %c0_i32 = arith.constant 0 : i32
    %6 = arith.cmpi eq, %c16_i32, %c0_i32 : i32
    %c1_i32 = arith.constant 1 : i32
    %7 = arith.select %6, %c1_i32, %c16_i32 : i32
    %8 = vector.broadcast %7 : i32 to vector<8x256xi32>
    %9 = arith.remsi %5, %8 : vector<8x256xi32>
    %c0_i32_5 = arith.constant 0 : i32
    %10 = vector.broadcast %c0_i32_5 : i32 to vector<8x256xi32>
    %11 = arith.cmpi ne, %9, %10 : vector<8x256xi32>
    %c0_i32_6 = arith.constant 0 : i32
    %12 = vector.broadcast %c0_i32_6 : i32 to vector<8x256xi32>
    %13 = arith.cmpi slt, %9, %12 : vector<8x256xi32>
    %c0_i32_7 = arith.constant 0 : i32
    %14 = arith.cmpi slt, %7, %c0_i32_7 : i32
    %15 = vector.broadcast %14 : i1 to vector<8x256xi1>
    %16 = vector.broadcast %15 : vector<8x256xi1> to vector<8x256xi1>
    %17 = arith.xori %13, %16 : vector<8x256xi1>
    %18 = arith.andi %17, %11 : vector<8x256xi1>
    %19 = vector.broadcast %7 : i32 to vector<8x256xi32>
    %20 = arith.addi %9, %19 : vector<8x256xi32>
    %21 = arith.select %18, %20, %9 : vector<8x256xi1>, vector<8x256xi32>
    %c1_i32_8 = arith.constant 1 : i32
    %22 = vector.broadcast %c1_i32_8 : i32 to vector<8x256xi32>
    %23 = arith.cmpi sge, %21, %22 : vector<8x256xi32>
    %c14_i32 = arith.constant 14 : i32
    %24 = vector.broadcast %c14_i32 : i32 to vector<8x256xi32>
    %25 = arith.cmpi sle, %21, %24 : vector<8x256xi32>
    %c1_i32_9 = arith.constant 1 : i32
    %26 = tpu.dynamic_rotate %1 by %c1_i32_9 dim 1 : vector<8x256xf32>, i32 -> vector<8x256xf32>
    %cst = arith.constant 0.000000e+00 : f32
    %27 = vector.broadcast %cst : f32 to vector<8x256xf32>
    %28 = arith.select %23, %26, %27 : vector<8x256xi1>, vector<8x256xf32>
    %c255_i32 = arith.constant 255 : i32
    %29 = tpu.dynamic_rotate %1 by %c255_i32 dim 1 : vector<8x256xf32>, i32 -> vector<8x256xf32>
    %cst_10 = arith.constant 0.000000e+00 : f32
    %30 = vector.broadcast %cst_10 : f32 to vector<8x256xf32>
    %31 = arith.select %25, %29, %30 : vector<8x256xi1>, vector<8x256xf32>
    %32 = tpu.concatenate %28, %1, %31 in 0 : vector<8x256xf32>, vector<8x256xf32>, vector<8x256xf32> -> vector<24x256xf32>
    %c0_11 = arith.constant 0 : index
    %c0_12 = arith.constant 0 : index
    %c0_13 = arith.constant 0 : index
    %33 = vector.load %arg4[%c0_11, %c0_12, %c0_13] : memref<3x16x24xf32, #tpu.memory_space<vmem>>, vector<1x16x24xf32>
    %34 = vector.shape_cast %33 : vector<1x16x24xf32> to vector<16x24xf32>
    %cst_14 = arith.constant dense<0.000000e+00> : vector<16x256xf32>
    %35 = tpu.matmul %34, %32, %cst_14 {dimension_numbers = #tpu.dot_dimension_numbers<[1], [0], [0], [1], [0, 0, 1, 1], [], []>} : vector<16x24xf32>, vector<24x256xf32>, vector<16x256xf32> -> vector<16x256xf32>
    %c368_i32 = arith.constant 368 : i32
    %36 = tpu.dynamic_rotate %4 by %c368_i32 dim 1 : vector<8x384xf32>, i32 -> vector<8x384xf32>
    %37 = vector.extract_strided_slice %36 {offsets = [0, 0], sizes = [8, 256], strides = [1, 1]} : vector<8x384xf32> to vector<8x256xf32>
    %c1_i32_15 = arith.constant 1 : i32
    %38 = tpu.dynamic_rotate %37 by %c1_i32_15 dim 1 : vector<8x256xf32>, i32 -> vector<8x256xf32>
    %cst_16 = arith.constant 0.000000e+00 : f32
    %39 = vector.broadcast %cst_16 : f32 to vector<8x256xf32>
    %40 = arith.select %23, %38, %39 : vector<8x256xi1>, vector<8x256xf32>
    %c255_i32_17 = arith.constant 255 : i32
    %41 = tpu.dynamic_rotate %37 by %c255_i32_17 dim 1 : vector<8x256xf32>, i32 -> vector<8x256xf32>
    %cst_18 = arith.constant 0.000000e+00 : f32
    %42 = vector.broadcast %cst_18 : f32 to vector<8x256xf32>
    %43 = arith.select %25, %41, %42 : vector<8x256xi1>, vector<8x256xf32>
    %44 = tpu.concatenate %40, %37, %43 in 0 : vector<8x256xf32>, vector<8x256xf32>, vector<8x256xf32> -> vector<24x256xf32>
    %c1 = arith.constant 1 : index
    %c0_19 = arith.constant 0 : index
    %c0_20 = arith.constant 0 : index
    %45 = vector.load %arg4[%c1, %c0_19, %c0_20] : memref<3x16x24xf32, #tpu.memory_space<vmem>>, vector<1x16x24xf32>
    %46 = vector.shape_cast %45 : vector<1x16x24xf32> to vector<16x24xf32>
    %cst_21 = arith.constant dense<0.000000e+00> : vector<16x256xf32>
    %47 = tpu.matmul %46, %44, %cst_21 {dimension_numbers = #tpu.dot_dimension_numbers<[1], [0], [0], [1], [0, 0, 1, 1], [], []>} : vector<16x24xf32>, vector<24x256xf32>, vector<16x256xf32> -> vector<16x256xf32>
    %48 = arith.addf %35, %47 : vector<16x256xf32>
    %c352_i32 = arith.constant 352 : i32
    %49 = tpu.dynamic_rotate %4 by %c352_i32 dim 1 : vector<8x384xf32>, i32 -> vector<8x384xf32>
    %50 = vector.extract_strided_slice %49 {offsets = [0, 0], sizes = [8, 256], strides = [1, 1]} : vector<8x384xf32> to vector<8x256xf32>
    %c1_i32_22 = arith.constant 1 : i32
    %51 = tpu.dynamic_rotate %50 by %c1_i32_22 dim 1 : vector<8x256xf32>, i32 -> vector<8x256xf32>
    %cst_23 = arith.constant 0.000000e+00 : f32
    %52 = vector.broadcast %cst_23 : f32 to vector<8x256xf32>
    %53 = arith.select %23, %51, %52 : vector<8x256xi1>, vector<8x256xf32>
    %c255_i32_24 = arith.constant 255 : i32
    %54 = tpu.dynamic_rotate %50 by %c255_i32_24 dim 1 : vector<8x256xf32>, i32 -> vector<8x256xf32>
    %cst_25 = arith.constant 0.000000e+00 : f32
    %55 = vector.broadcast %cst_25 : f32 to vector<8x256xf32>
    %56 = arith.select %25, %54, %55 : vector<8x256xi1>, vector<8x256xf32>
    %57 = tpu.concatenate %53, %50, %56 in 0 : vector<8x256xf32>, vector<8x256xf32>, vector<8x256xf32> -> vector<24x256xf32>
    %c2 = arith.constant 2 : index
    %c0_26 = arith.constant 0 : index
    %c0_27 = arith.constant 0 : index
    %58 = vector.load %arg4[%c2, %c0_26, %c0_27] : memref<3x16x24xf32, #tpu.memory_space<vmem>>, vector<1x16x24xf32>
    %59 = vector.shape_cast %58 : vector<1x16x24xf32> to vector<16x24xf32>
    %cst_28 = arith.constant dense<0.000000e+00> : vector<16x256xf32>
    %60 = tpu.matmul %59, %57, %cst_28 {dimension_numbers = #tpu.dot_dimension_numbers<[1], [0], [0], [1], [0, 0, 1, 1], [], []>} : vector<16x24xf32>, vector<24x256xf32>, vector<16x256xf32> -> vector<16x256xf32>
    %61 = arith.addf %48, %60 : vector<16x256xf32>
    %c0_29 = arith.constant 0 : index
    %c0_30 = arith.constant 0 : index
    %62 = vector.load %arg5[%c0_29, %c0_30] : memref<16x1xf32, #tpu.memory_space<vmem>>, vector<16x1xf32>
    %63 = vector.broadcast %62 : vector<16x1xf32> to vector<16x256xf32>
    %64 = arith.addf %61, %63 : vector<16x256xf32>
    %c0_31 = arith.constant 0 : index
    %c0_32 = arith.constant 0 : index
    %c0_33 = arith.constant 0 : index
    %65 = vector.load %arg6[%c0_31, %c0_32, %c0_33] : memref<1x16x256xf32, #tpu.memory_space<vmem>>, vector<1x16x256xf32>
    %66 = vector.shape_cast %65 : vector<1x16x256xf32> to vector<16x256xf32>
    %67 = vector.shape_cast %64 : vector<16x256xf32> to vector<1x16x256xf32>
    tpu.vector_store %arg6[%c0_31, %c0_32, %c0_33], %67 {strides = array<i32>} : memref<1x16x256xf32, #tpu.memory_space<vmem>>, vector<1x16x256xf32>,
    return
  }
  func.func @transform_0(%arg0: i32, %arg1: i32) -> (i32, i32, i32) {
    %c0_i32 = arith.constant 0 : i32
    %c0_i32_0 = arith.constant 0 : i32
    return %arg0, %c0_i32, %arg1 : i32, i32, i32
  }
  func.func @transform_1(%arg0: i32, %arg1: i32) -> (i32, i32, i32) {
    %c1_i32 = arith.constant 1 : i32
    %0 = arith.addi %arg1, %c1_i32 : i32
    %c2_i32 = arith.constant 2 : i32
    %1 = arith.muli %0, %c2_i32 : i32
    %c0_i32 = arith.constant 0 : i32
    %c0_i32_0 = arith.constant 0 : i32
    return %arg0, %c0_i32, %1 : i32, i32, i32
  }
  func.func @transform_2(%arg0: i32, %arg1: i32) -> (i32, i32, i32) {
    %c0_i32 = arith.constant 0 : i32
    %c0_i32_0 = arith.constant 0 : i32
    %c0_i32_1 = arith.constant 0 : i32
    %c0_i32_2 = arith.constant 0 : i32
    return %c0_i32, %c0_i32_0, %c0_i32_1 : i32, i32, i32
  }
  func.func @transform_3(%arg0: i32, %arg1: i32) -> (i32, i32) {
    %c0_i32 = arith.constant 0 : i32
    %c0_i32_0 = arith.constant 0 : i32
    %c0_i32_1 = arith.constant 0 : i32
    return %c0_i32, %c0_i32_0 : i32, i32
  }
  func.func @transform_4(%arg0: i32, %arg1: i32) -> (i32, i32, i32) {
    %c0_i32 = arith.constant 0 : i32
    %c0_i32_0 = arith.constant 0 : i32
    return %arg0, %c0_i32, %arg1 : i32, i32, i32
  }
}

</mosaic_0001>

<bundles_post_ra>
// kernel: tpu_custom_call.1
= control target key start
LH: loop header
LB: loop body
LE: loop exit
PB: predicated region body
PF: predicated region fallthrough
CT: control target
= control target key end

     0   :  { %s1583_s0 = inlined_call_operand.hbm [shape: f32[2,8,384], index: 0, kind: input, shape index: {}]   ;;  %s1584_s1 = inlined_call_operand.hbm [shape: f32[2,8,384], index: 1, kind: input, shape index: {}]   ;;  %s1585_s2 = inlined_call_operand.hbm [shape: f32[3,16,24], index: 2, kind: input, shape index: {}]   ;;  %s1586_s3 = inlined_call_operand.vmem [shape: f32[16,1], index: 3, kind: input, shape index: {}]   ;;  %s1587_s4 = inlined_call_operand.hbm [shape: f32[2,16,256], index: 4, kind: output, shape index: {}]  }
   0x1   :  { %1593 = sst [smem:[#allocation14_spill]] %s1583_s0 }
   0x2   :  { %1594 = sst [smem:[#allocation15_spill]] %s1585_s2 }
   0x3   :  { %9 = vsyncpa [#allocation3], 0 }
   0x4   :  { %11 = vsyncpa [#allocation3 + $0x1], 0 }
   0x5   :  { %12 = vsyncpa [#allocation6], 0 }
   0x6   :  { %14 = vsyncpa [#allocation6 + $0x1], 0 }
   0x7   :  { %15 = vsyncpa [#allocation4], 0 }
   0x8   :  { %17 = vsyncpa [#allocation4 + $0x1], 0  ;;  %s1226_s15 = smov 0   ;;  %s1228_s16 = smov 0  }
   0x9   :  { %s1230_s17 = smov 0   ;;  %s1232_s18 = smov 0  }
   0xa   :  { %s1234_s19 = smov 0   ;;  %s1236_s20 = smov 0  }
   0xb LB: > { %s1257_s21 = sadd.s32 4294967295, %s1184_s20   ;;  %s831_s22 = sadd.s32 4294967294, %s1184_s20   ;;  %s1184_s20 = sphi %s1236_s20, %s23_s20   ;;  %s1180_s19 = sphi %s1234_s19, %s1626_s19   ;;  %s1176_s18 = sphi %s1232_s18, %s1625_s18   ;;  %s1172_s17 = sphi %s1230_s17, %s1624_s17   ;;  %s1168_s16 = sphi %s1228_s16, %s1623_s16   ;;  %s1164_s15 = sphi %s1226_s15, %s1622_s15  }
   0xc   : > { %p57_p0 = scmp.ne.s32.totalorder %s1168_s16, %s1164_s15  ;;  %p1588_p1 = scmp.eq.s32.totalorder %s1257_s21, 0 }
   0xd   : > { %p163_p3 = scmp.eq.s32.totalorder %s831_s22, 1  ;;  %p832_p5 = scmp.ge.s32.totalorder %s1184_s20, 1 }
   0xe   : > { %p1266_p4 = por %p1588_p1, %p57_p0  ;;  %p170_p7 = scmp.lt.s32.totalorder %s1184_s20, 3 }
   0xf   : > { %p1271_p6 = por %p163_p3, %p57_p0  ;;  %s1186_s26 = smov [#allocation7]  }
  0x10   : > { %s1595_s23 = scalar_select %p1266_p4, 1, 0 }
  0x11   : > { %s1596_s24 = scalar_select %p1271_p6, 1, 0 }
  0x12   : > { %p1276_p8 = pnand %p832_p5, %p170_p7  ;;  %s182_s27 = sshll.u32 %s1186_s26, 4  ;;  %s183_s27 = int_to_ptr.vmem [resolvable:$true] %s182_s27 }
  0x13   : > { %s35_s29 = sadd.s32 1, %s1180_s19  ;;  %s1599_s2 = sld [smem:[#allocation15_spill]] }
  0x14   : > { %s1597_s25 = scalar_select %p1276_p8, 1, 0 }
  0x15   : > { %p909_p9 = pneg %p1276_p8 }
  0x17   : > { %p1285_p11 = pnand %p909_p9, %p1588_p1 }
  0x19   : > { %s1005_s6 = scalar_lea.hbm %s1599_s2, 768  ;;  %p1007_p13 = pneg %p1285_p11 }
  0x1a   : > { %p1006_p12 = scmp.ne.s32.totalorder %s1599_s2, %s1005_s6  ;;  %p1012_p5 = scmp.lt.u32.totalorder %s1005_s6, %s1599_s2 }
  0x1c   : > { %p1008_p0 = pnand %p1007_p13, %p1006_p12 }
  0x1e   : > { %p1009_p3 = pneg %p1008_p0 }
  0x20   : > { %p1014_p7 = pnand %p1012_p5, %p1009_p3 }
  0x22   : > { %1017 = shalt.err (!%p1014_p7)
}
  0x23   : > { %s1018_s11 = scalar_lea.vmem %s183_s27, 768  ;;  %p1026_p2 = scmp.lt.s32.totalorder %s183_s27, %s183_s27 }
  0x24   : > { %p1019_p9 = scmp.ne.s32.totalorder %s183_s27, %s1018_s11  ;;  %p1027_p6 = scmp.lt.s32.totalorder %s1018_s11, %s1018_s11 }
  0x26   : > { %p1021_p10 = pnand %p1019_p9, %p1007_p13  ;;  %p1028_p4 = por %p1027_p6, %p1026_p2 }
  0x28   : > { %p1022_p1 = pneg %p1021_p10 }
  0x2a   : > { %p1029_p8 = pnand %p1028_p4, %p1022_p1 }
  0x2c   : > { %1032 = shalt.err (!%p1029_p8)
}
  0x2d   : > { %s1187_s12 = smov 128   ;;  %s1188_s13 = smov 8  }
  0x2e   : > { %912 = dma.hbm_to_vmem [thread:$0]  (!%p1285_p11), %s1599_s2, 768, %s183_s27, [#allocation6], %s1187_s12, %s1187_s12, %s1188_s13  }
  0x2f   : > { %p37_p1 = scmp.ge.s32.totalorder %s35_s29, 2  ;;  %s44_s26 = sadd.s32 1, %s1172_s17 }
  0x30   : > { %p51_p2 = scmp.ne.s32.totalorder %s1172_s17, %s1168_s16  ;;  %p52_p4 = scmp.eq.s32.totalorder %s1184_s20, 0 }
  0x31   : > { %s1628_s29 = smov (%p37_p1, %s35_s29), 0  ;;  %p1601_p8 = scmp.eq.s32.totalorder %s1257_s21, 1 }
  0x32   : > { %1600 = sst [smem:[#allocation13_spill]] %s1628_s29  ;;  %p53_p6 = por %p52_p4, %p51_p2 }
  0x33   : > { %p1314_p10 = por %p1601_p8, %p51_p2  ;;  %s39_s28 = ssub.s32 %s1180_s19, %s1628_s29 }
  0x34   : > { %p925_p12 = scmp.lt.s32.totalorder %s1184_s20, 2  ;;  %p42_p13 = scmp.eq.s32.totalorder %s39_s28, 0 }
  0x35   : > { %s1602_s30 = scalar_select %p1314_p10, 1, 0 }
  0x36   : > { %s1322_s5 = sand.u32 1, %s1172_s17   ;;  %s898_s7 = smul.u32 384, %s1180_s19 }
  0x37   : > { %s835_s27 = sshll.u32 %s1322_s5, 4  ;;  %p1329_p11 = pnand %p925_p12, %p53_p6 }
  0x38   : > { %s1326_s6 = scalar_select %p42_p13, %s1172_s17, %s44_s26  }
  0x39   : > { %s203_s8 = scalar_lea.vmem [#allocation2], %s835_s27  ;;  %s1604_s0 = sld [smem:[#allocation14_spill]] }
  0x3a   : > { %s219_s9 = sshll.u32 %s203_s8, 4  ;;  %s200_s22 = scalar_lea.sflag [#allocation3], %s1322_s5  ;;  %s1340_s9 = int_to_ptr.vmem [resolvable:$true] %s219_s9 }
  0x3b   : > { %p1035_p3 = pneg %p1329_p11 }
  0x3f   : > { %s1338_s13 = scalar_lea.hbm %s1604_s0, %s898_s7  ;;  %s1038_s8 = scalar_lea.hbm %s1604_s0, 768 }
  0x40   : > { %s1033_s26 = scalar_lea.hbm %s1338_s13, 256  ;;  %p1039_p9 = scmp.lt.u32.totalorder %s1338_s13, %s1604_s0 }
  0x41   : > { %p1034_p0 = scmp.ne.s32.totalorder %s1338_s13, %s1033_s26  ;;  %p1040_p1 = scmp.lt.u32.totalorder %s1038_s8, %s1033_s26 }
  0x42   : > { %p1042_p4 = scmp.lt.u32.totalorder %s1033_s26, %s1338_s13 }
  0x43   : > { %p1036_p5 = pnand %p1035_p3, %p1034_p0  ;;  %p1041_p2 = por %p1040_p1, %p1039_p9 }
  0x45   : > { %p1037_p7 = pneg %p1036_p5  ;;  %p1043_p6 = por %p1042_p4, %p1041_p2 }
  0x47   : > { %p1044_p8 = pnand %p1043_p6, %p1037_p7 }
  0x49   : > { %1047 = shalt.err (!%p1044_p8)
}
  0x4a   : > { %s1048_s14 = scalar_lea.vmem %s1340_s9, 256  ;;  %s1189_s28 = smov [#allocation2]  }
  0x4b   : > { %p1049_p12 = scmp.ne.s32.totalorder %s1340_s9, %s1048_s14  ;;  %s1053_s27 = sshll.u32 %s1189_s28, 4  ;;  %s1054_s27 = int_to_ptr.vmem [resolvable:$false] %s1053_s27 }
  0x4c   : > { %s1055_s11 = scalar_lea.vmem %s1054_s27, 512  ;;  %p1056_p5 = scmp.lt.s32.totalorder %s1340_s9, %s1054_s27 }
  0x4d   : > { %p1051_p13 = pnand %p1049_p12, %p1035_p3  ;;  %p1057_p9 = scmp.lt.s32.totalorder %s1055_s11, %s1048_s14 }
  0x4f   : > { %p1052_p0 = pneg %p1051_p13  ;;  %p1058_p1 = por %p1057_p9, %p1056_p5 }
  0x51   : > { %p1059_p2 = pnand %p1058_p1, %p1052_p0 }
  0x53   : > { %1062 = shalt.err (!%p1059_p2)
}
  0x54   : > { %916 = dma.hbm_to_vmem [thread:$0]  (!%p1329_p11), %s1338_s13, 256, %s1340_s9, %s200_s22  }
  0x55   : > { %s837_s26 = sshll.u32 %s1322_s5, 3  ;;  %s752_s28 = scalar_lea.hbm %s1584_s1, %s898_s7 }
  0x56   : > { %s1375_s27 = scalar_lea.hbm %s752_s28, 256  ;;  %s230_s14 = scalar_lea.vmem [#allocation5], %s837_s26 }
  0x57   : > { %s241_s11 = sshll.u32 %s230_s14, 4  ;;  %s1605_s0 = sand.u32 1, %s1184_s20   ;;  %s242_s11 = int_to_ptr.vmem [resolvable:$true] %s241_s11 }
  0x58   : > { %s227_s2 = scalar_lea.sflag [#allocation6], %s1605_s0  ;;  %s1093_s29 = scalar_lea.hbm %s752_s28, 384 }
  0x59   : > { %p1064_p7 = scmp.ne.s32.totalorder %s1375_s27, %s1093_s29  ;;  %s1068_s7 = scalar_lea.hbm %s1584_s1, 768 }
  0x5a   : > { %p1069_p8 = scmp.lt.u32.totalorder %s1375_s27, %s1584_s1  ;;  %p1070_p12 = scmp.lt.u32.totalorder %s1068_s7, %s1093_s29 }
  0x5b   : > { %p1066_p4 = pnand %p1064_p7, %p1035_p3  ;;  %p1072_p0 = scmp.lt.u32.totalorder %s1093_s29, %s1375_s27 }
  0x5c   : > { %p1071_p13 = por %p1070_p12, %p1069_p8 }
  0x5d   : > { %p1067_p6 = pneg %p1066_p4 }
  0x5e   : > { %p1073_p5 = por %p1072_p0, %p1071_p13 }
  0x60   : > { %p1074_p9 = pnand %p1073_p5, %p1067_p6 }
  0x62   : > { %1077 = shalt.err (!%p1074_p9)
}
  0x63   : > { %s1078_s0 = scalar_lea.vmem %s242_s11, 128  ;;  %s1190_s26 = smov [#allocation5]  }
  0x64   : > { %p1079_p1 = scmp.ne.s32.totalorder %s242_s11, %s1078_s0  ;;  %s1083_s8 = sshll.u32 %s1190_s26, 4  ;;  %s1084_s8 = int_to_ptr.vmem [resolvable:$false] %s1083_s8 }
  0x65   : > { %s1085_s12 = scalar_lea.vmem %s1084_s8, 256  ;;  %p1086_p4 = scmp.lt.s32.totalorder %s242_s11, %s1084_s8 }
  0x66   : > { %p1081_p2 = pnand %p1079_p1, %p1035_p3  ;;  %p1087_p10 = scmp.lt.s32.totalorder %s1085_s12, %s1078_s0 }
  0x68   : > { %p1082_p7 = pneg %p1081_p2  ;;  %p1088_p8 = por %p1087_p10, %p1086_p4 }
  0x6a   : > { %p1089_p12 = pnand %p1088_p8, %p1082_p7 }
  0x6c   : > { %1092 = shalt.err (!%p1089_p12)
}
  0x6d   : > { %919 = dma.hbm_to_vmem [thread:$0]  (!%p1329_p11), %s1375_s27, 128, %s242_s11, %s227_s2  }
  0x6e   : > { %p1606_p6 = scmp.ne.s32.totalorder %s1597_s25, 0 }
  0x6f   : > { %s1400_s29 = sand.u32 (!%p1606_p6), 1, %s1168_s16   ;;  %p1607_p3 = scmp.ne.s32.totalorder (!%p1606_p6), %s1595_s23, 0 }
  0x70   : > { %250 = sbr.rel (%p1606_p6) target bundleno = 616 (0x268), region = 36  ;;  %s840_s28 = sshll.u32 (!%p1606_p6), %s1400_s29, 4 }
  0x71   : > { %s253_s14 = scalar_lea.sflag (!%p1606_p6), [#allocation3], %s1400_s29  ;;  %s256_s5 = scalar_lea.vmem (!%p1606_p6), [#allocation2], %s840_s28 }
  0x77   : > { %1147 = dma.done.wait (%p1607_p3), %s253_s14, 256  }
  0x78   : > { %1149 = vsyncadd (%p1607_p3), %s253_s14, 4294967040  ;;  %s261_s2 = sand.u32 1, %s1257_s21   ;;  %s841_s25 = sshll.u32 %s1400_s29, 3 }
  0x79   : > { %s262_s10 = scalar_lea.sflag [#allocation6], %s261_s2  ;;  %s265_s27 = scalar_lea.vmem [#allocation5], %s841_s25 }
  0x7a   : > { %1151 = dma.done.wait (%p1607_p3), %s262_s10, 128  }
  0x7b   : > { %1153 = vsyncadd (%p1607_p3), %s262_s10, 4294967168  ;;  %p1608_p10 = scmp.eq.s32.totalorder %s1257_s21, 0 }
  0x7d   : > { %1155 = dma.done.wait (%p1608_p10), [#allocation6], 768   ;;  %p1609_p11 = pmov %p1608_p10 }
  0x7e   : > { %v309_v0 = vld [vmem:[%s265_s27] sm:$0xff]  ;;  %s1191_s11 = smov 112   ;;  %v308_v2 = vld [vmem:[%s256_s5 + $0x8] sm:$0xff]  ;;  %s1192_s9 = smov 96   ;;  %v310_v4 = vlaneseq  ;;  %v1195_v8 = vmov 0.0   ;;  %vm1196_vm5 = vmmov 1  }
  0x7f   : > { %1157 = vsyncadd (%p1609_p11), [#allocation6], 4294966528  ;;  %v307_v1 = vld [vmem:[%s256_s5] sm:$0xff]  ;;  %365 = vrot.lane.b32.xlu1 %v309_v0, %s1191_s11  ;;  %s1193_s23 = smov 1   ;;  %s1194_s7 = smov 127   ;;  %543 = vmatprep.mubr.f32.mxu0 %v1195_v8  ;;  %v1197_v28 = vmov 0  }
  0x80   : > { %361 = vrot.lane.b32.xlu0 %v307_v1, %s1191_s11  ;;  %v988_v3 = vpack.i.bf16 %v308_v2, %v307_v1  ;;  %v1419_v5 = vand.u32 127, %v310_v4  ;;  %460 = vmatprep.mubr.f32.mxu1 %v1195_v8  ;;  %v672_v32 = vld [vmem:[%s1586_s3 + $0x8] sm:$0xff]  ;;  %v671_v33 = vld [vmem:[%s1586_s3] sm:$0xff]  ;;  %vm389_vm11 = vcmask 195584   ;;  %v359_v51 = vld [vmem:[#allocation7] sm:$0xff]  ;;  %s843_s26 = sshll.u32 %s1400_s29, 5 }
  0x81   : > { %1003 = vset.pattern.permute.xlu1 %v1197_v28  ;;  %1004 = vset.pattern.permute.xlu0 %v1197_v28  ;;  %v387_v59 = vld [vmem:[#allocation7 + $0x10] sm:$0xff]  ;;  %v360_v60 = vld [vmem:[#allocation7 + $0x8] sm:$0xff]  ;;  %s298_s8 = scalar_lea.vmem [#allocation8], %s843_s26  ;;  %s867_s28 = sshll.u32 %s1176_s18, 9 }
  0x82   : > { %vm367_vm0 = vcmp.lt.s32.totalorder %v1419_v5, 112  ;;  %v312_v11 = vadd.s32 128, %v1419_v5  ;;  %vm562_vm1 = vcmp.lt.s32.totalorder %v1419_v5, 96  ;;  %v317_v20 = vand.u32 15, %v1419_v5  ;;  %s707_s12 = sshll.u32 %s298_s8, 4  ;;  %s1534_s2 = scalar_lea.hbm %s1587_s4, %s867_s28  ;;  %s1529_s12 = int_to_ptr.vmem [resolvable:$true] %s707_s12 }
  0x83   : > { %556 = vrot.lane.b32.xlu1 %v307_v1, %s1192_s9  ;;  %vm345_vm3 = vcmp.lt.s32.totalorder %v1419_v5, 1  ;;  %vm354_vm8 = vcmp.lt.s32.totalorder %v1419_v5, 127  ;;  %s692_s18 = scalar_lea.sflag [#allocation4], %s1400_s29  ;;  %s1094_s25 = scalar_lea.vmem %s1529_s12, 512 }
  0x84   : > { %363 = vrot.lane.b32.xlu0 %v308_v2, %s1191_s11  ;;  %v324_v17 = vand.u32 15, %v312_v11  ;;  %vm337_vm4 = vcmp.ge.s32.totalorder %v317_v20, 1  ;;  %vm1469_vm10 = vcmp.le.s32.totalorder %v317_v20, 14  ;;  %p1095_p13 = scmp.ne.s32.totalorder %s1529_s12, %s1094_s25  ;;  %p1618_p0 = scmp.ne.s32.totalorder %s1602_s30, 0 }
  0x85   : > { %vm1444_vm7 = vmpackc.low %vm1196_vm5, %vm337_vm4  ;;  %s1198_s10 = smov [#allocation8]  }
  0x86   : > { %vm338_vm2 = vcmp.ge.s32.totalorder %v324_v17, 1  ;;  %vm1462_vm9 = vcmp.le.s32.totalorder %v324_v17, 14  ;;  %p1096_p5 = pnand %p1095_p13, %p1618_p0  ;;  %s1098_s27 = sshll.u32 %s1198_s10, 4  ;;  %s1099_s27 = int_to_ptr.vmem [resolvable:$false] %s1098_s27 }
  0x87   : > { %560 = vrot.lane.b32.xlu1 %v309_v0, %s1192_s9  ;;  %vm1436_vm6 = vmpackc.low %vm1196_vm5, %vm338_vm2  ;;  %s1100_s11 = scalar_lea.vmem %s1099_s27, 1024  ;;  %p1101_p1 = scmp.lt.s32.totalorder %s1529_s12, %s1099_s27 }
  0x88   : > { %558 = vrot.lane.b32.xlu0 %v308_v2, %s1192_s9  ;;  %p1097_p9 = pneg %p1096_p5  ;;  %p1102_p2 = scmp.lt.s32.totalorder %s1100_s11, %s1094_s25 }
  0x8a   : > { %p1103_p7 = por %p1102_p2, %p1101_p1 }
  0x8c   : > { %989 = vrot.lane.b32.xlu0 %v988_v3, %s1193_s23  ;;  %v583_v3 = vld [vmem:[#allocation7 + $0x28] sm:$0xff]  ;;  %p1104_p4 = pnand %p1103_p7, %p1097_p9 }
  0x90   : > { %350 = vrot.lane.b32.xlu0 %v307_v1, %s1194_s7 }
  0xf1   : > { %v366_v6 = vpop.permute.xlu1 %365 }
  0xf2   : > { %v362_v7 = vpop.permute.xlu0 %361 }
  0xf5   : > { %v557_v9 = vpop.permute.xlu1 %556 }
  0xf6   : > { %v364_v10 = vpop.permute.xlu0 %363 }
  0xf7   : > { %v368_v12 = vsel %vm367_vm0, %v364_v10, %v366_v6  ;;  %v1425_v13 = vsel %vm367_vm0, %v362_v7, %v364_v10 }
  0xf8   : > { %378 = vrot.lane.b32.xlu0 %v1425_v13, %s1194_s7  ;;  %v993_v14 = vpack.i.bf16 %v368_v12, %v1425_v13 }
  0xf9   : > { %v561_v15 = vpop.permute.xlu1 %560 }
  0xfa   : > { %994 = vrot.lane.b32.xlu1 %v993_v14, %s1193_s23  ;;  %v559_v16 = vpop.permute.xlu0 %558 }
  0xfb   : > { %v563_v18 = vsel %vm562_vm1, %v559_v16, %v561_v15  ;;  %v564_v19 = vsel %vm562_vm1, %v557_v9, %v559_v16 }
  0xfc   : > { %v998_v21 = vpack.i.bf16 %v563_v18, %v564_v19 }
  0xfe   : > { %352 = vrot.lane.b32.xlu1 %v308_v2, %s1194_s7  ;;  %999 = vrot.lane.b32.xlu0 %v998_v21, %s1193_s23  ;;  %v990_v22 = vpop.permute.xlu0 %989 }
  0xff   : > { %v992_v23 = vunpack.i.h.bf16 %v990_v22  ;;  %v991_v24 = vunpack.i.l.bf16 %v990_v22 }
 0x101   : > { %v346_v25 = vsel %vm345_vm3, %v991_v24, %v992_v23  ;;  %v347_v27 = vsel %vm345_vm3, %v992_v23, %v991_v24 }
 0x102   : > { %380 = vrot.lane.b32.xlu1 %v368_v12, %s1194_s7  ;;  %575 = vrot.lane.b32.xlu0 %v563_v18, %s1194_s7  ;;  %v874_v29 = vpack.c.bf16 %v308_v2, %v346_v25  ;;  %v877_v31 = vpack.c.bf16 %v307_v1, %v347_v27  ;;  %v351_v34 = vpop.permute.xlu0 %350  ;;  %v388_v1 = vld [vmem:[#allocation7 + $0x18] sm:$0xff]  ;;  %v582_v2 = vld [vmem:[#allocation7 + $0x20] sm:$0xff] }
 0x104   : > { %876 = vmatprep.subr.msk.bf16.mxu0 %vm1436_vm6, %v874_v29 }
 0x105   : > { %879 = vmatpush1.bf16.msk.msra.mxu0 %vm1444_vm7, %v877_v31 }
 0x106   : > { %573 = vrot.lane.b32.xlu1 %v564_v19, %s1194_s7  ;;  %680 = vperm.xlu0 %1004, %v672_v32  }
 0x10a   : > { %675 = vperm.xlu1 %1003, %v671_v33  }
 0x16a   : > { %v379_v35 = vpop.permute.xlu0 %378 }
 0x16c   : > { %v995_v36 = vpop.permute.xlu1 %994 }
 0x16d   : > { %v997_v37 = vunpack.i.h.bf16 %v995_v36  ;;  %v996_v38 = vunpack.i.l.bf16 %v995_v36 }
 0x16f   : > { %v374_v39 = vsel %vm345_vm3, %v996_v38, %v997_v37  ;;  %v375_v41 = vsel %vm345_vm3, %v997_v37, %v996_v38 }
 0x170   : > { %v353_v42 = vpop.permute.xlu1 %352  ;;  %v1000_v43 = vpop.permute.xlu0 %999  ;;  %v868_v44 = vpack.c.bf16 %v368_v12, %v374_v39  ;;  %v871_v45 = vpack.c.bf16 %v1425_v13, %v375_v41 }
 0x171   : > { %v355_v47 = vsel %vm354_vm8, %v351_v34, %v353_v42  ;;  %v356_v48 = vsel %vm354_vm8, %v353_v42, %v351_v34  ;;  %v1002_v49 = vunpack.i.h.bf16 %v1000_v43  ;;  %v1001_v50 = vunpack.i.l.bf16 %v1000_v43 }
 0x172   : > { %870 = vmatprep.subr.msk.bf16.mxu1 %vm1436_vm6, %v868_v44  ;;  %852 = vmatprep.subr.msk.mxu0 %vm1462_vm9, %v356_v48 }
 0x173   : > { %v569_v52 = vsel %vm345_vm3, %v1001_v50, %v1002_v49  ;;  %v570_v53 = vsel %vm345_vm3, %v1002_v49, %v1001_v50  ;;  %873 = vmatpush1.bf16.msk.msra.mxu1 %vm1444_vm7, %v871_v45  ;;  %853 = vmatpush1.msk.msra.mxu0 %vm1469_vm10, %v355_v47 }
 0x174   : > { %v880_v54 = vpack.c.bf16 %v563_v18, %v569_v52  ;;  %v883_v55 = vpack.c.bf16 %v564_v19, %v570_v53  ;;  %v381_v56 = vpop.permute.xlu1 %380  ;;  %854 = vmatmul.mubr.msk.f32.vlgmr.msra.gmra.mrb[0].mxu0 %vm389_vm11, %v359_v51  ;;  %v576_v61 = vpop.permute.xlu0 %575 }
 0x175   : > { %v382_v57 = vsel %vm354_vm8, %v379_v35, %v381_v56  ;;  %v383_v58 = vsel %vm354_vm8, %v381_v56, %v379_v35  ;;  %549 = vmatprep.mubr.f32.mxu0 %v1195_v8 }
 0x176   : > { %846 = vmatprep.subr.msk.mxu1 %vm1462_vm9, %v383_v58  ;;  %882 = vmatprep.subr.msk.bf16.mxu0 %vm1436_vm6, %v880_v54 }
 0x177   : > { %847 = vmatpush1.msk.msra.mxu1 %vm1469_vm10, %v382_v57  ;;  %885 = vmatpush1.bf16.msk.msra.mxu0 %vm1444_vm7, %v883_v55 }
 0x178   : > { %v574_v62 = vpop.permute.xlu1 %573  ;;  %848 = vmatmul.mubr.msk.f32.vlgmr.msra.gmra.mrb[0].mxu1 %vm389_vm11, %v387_v59  ;;  %855 = vmatmul.mubr.msk.f32.gmra.mrb[2].mxu0 %vm389_vm11, %v360_v60 }
 0x179   : > { %v577_v63 = vsel %vm354_vm8, %v574_v62, %v576_v61  ;;  %v578_v0 = vsel %vm354_vm8, %v576_v61, %v574_v62  ;;  %886 = vmatprep.subr.msk.bf16.mxu1 %vm1436_vm6, %v880_v54  ;;  %466 = vmatprep.mubr.f32.mxu1 %v1195_v8 }
 0x17a   : > { %888 = vmatpush1.bf16.msk.msra.mxu1 %vm1444_vm7, %v883_v55  ;;  %858 = vmatprep.subr.msk.mxu0 %vm1462_vm9, %v578_v0 }
 0x17b   : > { %887 = vmatprep.subr.msk.mxu1 %vm1462_vm9, %v578_v0  ;;  %859 = vmatpush1.msk.msra.mxu0 %vm1469_vm10, %v577_v63 }
 0x17c   : > { %654 = vmatprep.mubr.f32.mxu0 %v1195_v8  ;;  %849 = vmatmul.mubr.msk.f32.gmra.mrb[2].mxu1 %vm389_vm11, %v388_v1 }
 0x17d   : > { %860 = vmatmul.mubr.msk.f32.vlgmr.msra.gmra.mrb[0].mxu0 %vm389_vm11, %v582_v2  ;;  %660 = vmatprep.mubr.f32.mxu1 %v1195_v8 }
 0x17e   : > { %889 = vmatpush1.msk.msra.mxu1 %vm1469_vm10, %v577_v63 }
 0x180   : > { %861 = vmatmul.mubr.msk.f32.vlgmr.msra.gmra.mrb[4].mxu1 %vm389_vm11, %v583_v3 }
 0x185   : > { %v681_v19 = vpop.permute.xlu0 %680 }
 0x189   : > { %v676_v10 = vpop.permute.xlu1 %675 }
 0x24b   : > { %v462_v4 = vpop.f32.mrb[0].mxu1  ;;  %v551_v5 = vpop.f32.mrb[2].mxu0 }
 0x24c   : > { %v464_v6 = vpop.f32.mrb[1].mxu1  ;;  %v553_v7 = vpop.f32.mrb[3].mxu0 }
 0x24f   : > { %v468_v9 = vpop.f32.mrb[2].mxu1 }
 0x250   : > { %v552_v11 = vadd.f32 %v551_v5, %v468_v9  ;;  %v656_v12 = vpop.f32.mrb[0].mxu0  ;;  %v470_v13 = vpop.f32.mrb[3].mxu1 }
 0x251   : > { %v890_v14 = vadd.f32 %v656_v12, %v462_v4  ;;  %v554_v15 = vadd.f32 %v553_v7, %v470_v13  ;;  %v658_v8 = vpop.f32.mrb[1].mxu0 }
 0x252   : > { %v891_v16 = vadd.f32 %v658_v8, %v464_v6 }
 0x253   : > { %v683_v17 = vadd.f32 %v890_v14, %v676_v10  ;;  %v662_v18 = vpop.f32.mrb[4].mxu1 }
 0x254   : > { %v684_v20 = vadd.f32 %v891_v16, %v676_v10  ;;  %v669_v21 = vadd.f32 %v662_v18, %v552_v11  ;;  %v664_v22 = vpop.f32.mrb[5].mxu1 }
 0x255   : > { %687 = vst [vmem:[%s298_s8] sm:$0xff] %v683_v17  ;;  %v670_v23 = vadd.f32 %v664_v22, %v554_v15 }
 0x256   : > { %688 = vst [vmem:[%s298_s8 + $0x8] sm:$0xff] %v684_v20  ;;  %v685_v24 = vadd.f32 %v681_v19, %v669_v21 }
 0x257   : > { %v686_v25 = vadd.f32 %v681_v19, %v670_v23 }
 0x258   : > { %689 = vst [vmem:[%s298_s8 + $0x10] sm:$0xff] %v685_v24 }
 0x259   : > { %690 = vst [vmem:[%s298_s8 + $0x18] sm:$0xff] %v686_v25 }
 0x25a   : > { %1107 = shalt.err (!%p1104_p4)
}
 0x25b   : > { %s1108_s9 = scalar_lea.hbm %s1534_s2, 512  ;;  %s1112_s21 = scalar_lea.hbm %s1587_s4, 1024 }
 0x25c   : > { %p1109_p8 = scmp.ne.s32.totalorder %s1534_s2, %s1108_s9  ;;  %p1113_p3 = scmp.lt.u32.totalorder %s1534_s2, %s1587_s4 }
 0x25d   : > { %p1114_p10 = scmp.lt.u32.totalorder %s1112_s21, %s1108_s9  ;;  %p1116_p13 = scmp.lt.u32.totalorder %s1108_s9, %s1534_s2 }
 0x25e   : > { %p1110_p12 = pnand %p1109_p8, %p1618_p0 }
 0x25f   : > { %p1115_p11 = por %p1114_p10, %p1113_p3 }
 0x260   : > { %p1111_p6 = pneg %p1110_p12 }
 0x261   : > { %p1117_p5 = por %p1116_p13, %p1115_p11 }
 0x263   : > { %p1118_p9 = pnand %p1117_p5, %p1111_p6 }
 0x265   : > { %1121 = shalt.err (!%p1118_p9)
}
 0x266   : > { %s1199_s0 = smov 256   ;;  %s1200_s26 = smov 16  }
 0x267   : > { %907 = dma.vmem_to_hbm [thread:$0]  (%p1618_p0), %s1529_s12, 512, %s1534_s2, %s692_s18, %s1199_s0, %s1199_s0, %s1200_s26  }
 0x268 PF: > { %s722_s8 = sand.u32 1, %s1164_s15   ;;  %p1619_p1 = scmp.ne.s32.totalorder %s1596_s24, 0 }
 0x269   : > { %p1620_p2 = scmp.ge.s32.totalorder %s1184_s20, 2  ;;  %s723_s28 = scalar_lea.sflag [#allocation4], %s722_s8 }
 0x26b   : > { %p921_p7 = pnand %p1620_p2, %p1619_p1 }
 0x26d   : > { %1159 = dma.done.wait (!%p921_p7), %s723_s28, 512  }
 0x26e   : > { %1161 = vsyncadd (!%p921_p7), %s723_s28, 4294966784  ;;  %s23_s20 = sadd.s32 1, %s1184_s20   ;;  %s1621_s30 = sld [smem:[#allocation13_spill]] }
 0x26f   : > { %p20_p4 = scmp.ge.s32.totalorder %s23_s20, 4   ;;  %s1622_s15 = smov %s1168_s16 }
 0x270   : > { %s1623_s16 = smov %s1172_s17  ;;  %s1624_s17 = smov %s1326_s6 }
 0x271   : > { %s1625_s18 = smov %s1180_s19  ;;  %22 = sbr.rel (!%p20_p4) target bundleno = 11 (0xb), region = 100 }
 0x274   : > { %s1626_s19 = smov %s1621_s30 }
 0x278   :  { %728 = vsyncpa [#allocation3], 1 }
 0x279   :  { %730 = vsyncpa [#allocation3 + $0x1], 1 }
 0x27a   :  { %731 = vsyncpa [#allocation6], 1 }
 0x27b   :  { %733 = vsyncpa [#allocation6 + $0x1], 1 }
 0x27c   :  { %734 = vsyncpa [#allocation4], 1 }
 0x27d   :  { %736 = vsyncpa [#allocation4 + $0x1], 1 }

</bundles_post_ra>
